<compile_context>
chip_gen: v6e
topology: v6e:2x2x1
jax: 0.10.0
libtpu: 0.0.40
codegen_flags: <defaults>
</compile_context>

<pallas_src>
import functools
import itertools

import jax
import jax.numpy as jnp
from jax.experimental import pallas as pl
from jax.experimental.pallas import tpu as pltpu


def _round_up(x, m):
    return ((x + m - 1) // m) * m


# ----------------------------------------------------------------------------
# Pallas kernel: fused 3x3 conv (single matmul) + two 1x1 convs + box transform
# ----------------------------------------------------------------------------
def rpn_kernel(x_ref, wconv_ref, bconv_ref, wbbox_ref, bbbox_ref,
               wcls_ref, bcls_ref, anch_ref, anch_scale_ref,
               boxes_ref, trans_ref, scores_ref, *, c_in):
    # x_ref:          (T, 9*C) bf16 im2col slab (center tap = first C lanes)
    # wconv_ref:      (9*C, C) bf16 fused 3x3 conv weight
    # bconv_ref:      (1, C)   f32
    # wbbox_ref:      (C, NB)  bf16 1x1 conv (bbox_pred), lane-padded to NB
    # bbbox_ref:      (1, NB)  f32
    # wcls_ref:       (C, NC)  bf16 1x1 conv (cls_logits), lane-padded to NC
    # bcls_ref:       (1, NC)  f32
    # anch_ref:       (T, NB)  f32 anchors in (k*4 + coord) lane order
    # anch_scale_ref: (T, NB)  f32 per-lane scale (wa, ha, 0, 0 pattern)
    x = x_ref[...]                                   # (T, 9C) bf16
    feats = x[:, :c_in]                              # center tap == original feats

    # 3x3 conv (stride 1, pad 1) == one (T, 9C) x (9C, C) matmul
    rpn_feats = jnp.dot(x, wconv_ref[...],
                        preferred_element_type=jnp.float32) + bconv_ref[...]

    # bbox_pred: 1x1 conv on feats
    t = jnp.dot(feats, wbbox_ref[...],
                preferred_element_type=jnp.float32) + bbbox_ref[...]   # (T, NB)
    trans_ref[...] = t

    # cls_logits: 1x1 conv on rpn_feats (output of the 3x3 conv)
    s = jnp.dot(rpn_feats.astype(jnp.bfloat16), wcls_ref[...],
                preferred_element_type=jnp.float32) + bcls_ref[...]    # (T, NC)
    scores_ref[...] = s

    # apply_box_transform (elementwise), lane c encodes coord = c % 4:
    #   coord 0: xa + tx*wa      coord 1: ya + ty*ha
    #   coord 2: wa * exp(tw)    coord 3: ha * exp(th)
    a = anch_ref[...]
    a_sc = anch_scale_ref[...]
    coord = jax.lax.broadcasted_iota(jnp.int32, a.shape, 1) % 4
    is_wh = coord >= 2
    boxes_ref[...] = jnp.where(is_wh, a * jnp.exp(t), a + t * a_sc)


# ----------------------------------------------------------------------------
# JAX wrapper (layout conversion, anchor index math, tiling, lane padding)
# ----------------------------------------------------------------------------
def rpn_forward(imgs, feats, params, widths, heights, tile_hw=512):
    B, C, Hf, Wf = feats.shape
    assert B == 1 and imgs.shape[0] == 1, "AnchorGenerator requires batch size of 1"
    _, _, Him, Wim = imgs.shape
    K = len(widths) * len(heights)
    HW = Hf * Wf
    NB = _round_up(4 * K, 128)   # lane-dense bbox / box / transform width
    NC = _round_up(K, 128)       # lane-dense score width

    # tap order: center tap first so feats == first C lanes of the slab
    tap_order = [(1, 1)] + [(dy, dx) for dy in range(3) for dx in range(3)
                            if (dy, dx) != (1, 1)]

    # ---- NCHW -> flattened-NHWC im2col slab (HW, 9C), bf16 -------------------
    x_nhwc = jnp.transpose(feats[0], (1, 2, 0))                 # (Hf, Wf, C)
    xpad = jnp.pad(x_nhwc, ((1, 1), (1, 1), (0, 0)))            # (Hf+2, Wf+2, C)
    x9 = jnp.concatenate(
        [xpad[dy:dy + Hf, dx:dx + Wf, :].reshape(HW, C) for dy, dx in tap_order],
        axis=1).astype(jnp.bfloat16)                            # (HW, 9C)

    # ---- weights: PyTorch conv layouts -> fused matmul layouts ---------------
    wconv_t = params["conv_w"]                                  # (Cout, Cin, 3, 3)
    wconv = jnp.concatenate([wconv_t[:, :, dy, dx].T for dy, dx in tap_order],
                            axis=0).astype(jnp.bfloat16)        # (9*Cin, Cout)
    bconv = params["conv_b"].reshape(1, C).astype(jnp.float32)

    wbbox = jnp.zeros((C, NB), jnp.bfloat16).at[:, :4 * K].set(
        params["bbox_w"][:, :, 0, 0].T.astype(jnp.bfloat16))
    bbbox = jnp.zeros((1, NB), jnp.float32).at[:, :4 * K].set(
        params["bbox_b"].reshape(1, 4 * K).astype(jnp.float32))
    wcls = jnp.zeros((C, NC), jnp.bfloat16).at[:, :K].set(
        params["cls_w"][:, :, 0, 0].T.astype(jnp.bfloat16))
    bcls = jnp.zeros((1, NC), jnp.float32).at[:, :K].set(
        params["cls_b"].reshape(1, K).astype(jnp.float32))

    # ---- anchor generation (pure index math, same ordering as torch) ---------
    stride_y = Him // Hf
    stride_x = Wim // Wf
    sy, sx = jnp.meshgrid(jnp.arange(Hf, dtype=jnp.int32) * stride_y,
                          jnp.arange(Wf, dtype=jnp.int32) * stride_x,
                          indexing="ij")
    shifts = jnp.stack([sx.reshape(-1), sy.reshape(-1)], axis=1)        # (HW, 2)
    cells = jnp.array(list(itertools.product(widths, heights)),
                      dtype=jnp.int32)                                  # (K, 2)
    anchors = jnp.concatenate(
        [jnp.broadcast_to(shifts[:, None, :], (HW, K, 2)),
         jnp.broadcast_to(cells[None, :, :], (HW, K, 2))], axis=2)      # (HW, K, 4)

    anch_f = jnp.zeros((HW, NB), jnp.float32).at[:, :4 * K].set(
        anchors.astype(jnp.float32).reshape(HW, 4 * K))
    wa = anchors[..., 2].astype(jnp.float32)
    ha = anchors[..., 3].astype(jnp.float32)
    zer = jnp.zeros_like(wa)
    anch_scale = jnp.zeros((HW, NB), jnp.float32).at[:, :4 * K].set(
        jnp.stack([wa, ha, zer, zer], axis=2).reshape(HW, 4 * K))

    # ---- HW tiling (grid over spatial rows, double-buffered pipeline) --------
    tile = min(tile_hw, HW)
    tile = _round_up(tile, 8)                    # sublane-aligned tile
    num_tiles = pl.cdiv(HW, tile)
    HW_pad = num_tiles * tile
    if HW_pad != HW:
        pad = HW_pad - HW
        x9 = jnp.pad(x9, ((0, pad), (0, 0)))
        anch_f = jnp.pad(anch_f, ((0, pad), (0, 0)))
        anch_scale = jnp.pad(anch_scale, ((0, pad), (0, 0)))

    resident = lambda i: (0, 0)                  # weights/biases stay in VMEM
    tiled = lambda i: (i, 0)                     # per-tile rows

    boxes2d, trans2d, scores2d = pl.pallas_call(
        functools.partial(rpn_kernel, c_in=C),
        out_shape=(
            jax.ShapeDtypeStruct((HW_pad, NB), jnp.float32),   # boxes
            jax.ShapeDtypeStruct((HW_pad, NB), jnp.float32),   # transforms
            jax.ShapeDtypeStruct((HW_pad, NC), jnp.float32),   # scores
        ),
        grid_spec=pltpu.PrefetchScalarGridSpec(
            num_scalar_prefetch=0,
            grid=(num_tiles,),
            in_specs=[
                pl.BlockSpec((tile, 9 * C), tiled),      # x9 im2col slab
                pl.BlockSpec((9 * C, C), resident),      # wconv
                pl.BlockSpec((1, C), resident),          # bconv
                pl.BlockSpec((C, NB), resident),         # wbbox
                pl.BlockSpec((1, NB), resident),         # bbbox
                pl.BlockSpec((C, NC), resident),         # wcls
                pl.BlockSpec((1, NC), resident),         # bcls
                pl.BlockSpec((tile, NB), tiled),         # anchors
                pl.BlockSpec((tile, NB), tiled),         # anchor scales
            ],
            out_specs=(
                pl.BlockSpec((tile, NB), tiled),
                pl.BlockSpec((tile, NB), tiled),
                pl.BlockSpec((tile, NC), tiled),
            ),
        ),
        compiler_params=pltpu.CompilerParams(
            dimension_semantics=("parallel",)),
    )(x9, wconv, bconv, wbbox, bbbox, wcls, bcls, anch_f, anch_scale)

    # ---- slice off row / lane padding, reshape to PyTorch conventions --------
    boxes = boxes2d[:HW, :4 * K].reshape(1, HW * K, 4)
    transforms = trans2d[:HW, :4 * K].reshape(1, HW * K, 4)
    scores = scores2d[:HW, :K].reshape(1, HW * K, 1)
    anchors_out = anchors.reshape(1, HW * K, 4)   # int32 (torch returns int64)
    return boxes, anchors_out, transforms, scores


# ----------------------------------------------------------------------------
# Deterministic parameter init (synthetic; shapes follow the torch module)
# ----------------------------------------------------------------------------
def init_params(key, input_dim, num_anchors):
    k = jax.random.split(key, 6)
    s = 0.05
    return {
        "conv_w": s * jax.random.normal(k[0], (input_dim, input_dim, 3, 3), jnp.float32),
        "conv_b": s * jax.random.normal(k[1], (input_dim,), jnp.float32),
        "bbox_w": s * jax.random.normal(k[2], (num_anchors * 4, input_dim, 1, 1), jnp.float32),
        "bbox_b": s * jax.random.normal(k[3], (num_anchors * 4,), jnp.float32),
        "cls_w": s * jax.random.normal(k[4], (num_anchors, input_dim, 1, 1), jnp.float32),
        "cls_b": s * jax.random.normal(k[5], (num_anchors,), jnp.float32),
    }


if __name__ == "__main__":
    # Small config: input_dim=32, widths=(30,90), heights=(20,40) -> K=4
    widths = (30, 90)
    heights = (20, 40)
    input_dim = 32
    K = len(widths) * len(heights)

    key = jax.random.PRNGKey(0)
    k_img, k_feat, k_par = jax.random.split(key, 3)
    imgs = jax.random.normal(k_img, (1, 3, 64, 64), jnp.float32)          # (B, C, H, W)
    feats = jax.random.normal(k_feat, (1, input_dim, 8, 8), jnp.float32)  # (B, C', H', W')
    params = init_params(k_par, input_dim, K)

    boxes, anchors, transforms, scores = rpn_forward(imgs, feats, params, widths, heights)
    jax.block_until_ready((boxes, anchors, transforms, scores))

    assert boxes.shape == (1, 8 * 8 * K, 4)
    assert anchors.shape == (1, 8 * 8 * K, 4)
    assert transforms.shape == (1, 8 * 8 * K, 4)
    assert scores.shape == (1, 8 * 8 * K, 1)
    print("KERNEL_OK")
</pallas_src>

<mosaic_0001>
module attributes {stable_mosaic.version = 11 : i64} {
  func.func @rpn_kernel(%arg0: i32, %arg1: memref<64x288xbf16, #tpu.memory_space<vmem>>, %arg2: memref<288x32xbf16, #tpu.memory_space<vmem>>, %arg3: memref<1x32xf32, #tpu.memory_space<vmem>>, %arg4: memref<32x128xbf16, #tpu.memory_space<vmem>>, %arg5: memref<1x128xf32, #tpu.memory_space<vmem>>, %arg6: memref<32x128xbf16, #tpu.memory_space<vmem>>, %arg7: memref<1x128xf32, #tpu.memory_space<vmem>>, %arg8: memref<64x128xf32, #tpu.memory_space<vmem>>, %arg9: memref<64x128xf32, #tpu.memory_space<vmem>>, %arg10: memref<64x128xf32, #tpu.memory_space<vmem>>, %arg11: memref<64x128xf32, #tpu.memory_space<vmem>>, %arg12: memref<64x128xf32, #tpu.memory_space<vmem>>) attributes {dimension_semantics = [#tpu.dimension_semantics<parallel>], iteration_bounds = array<i64: 1>, scalar_prefetch = 0 : i64, scratch_operands = 0 : i64, tpu.core_type = #tpu.core_type<tc>, window_params = [{transform_indices = @transform_0, window_bounds = array<i64: 64, 288>}, {pipeline_mode = #tpu.pipeline_mode<synchronous>, transform_indices = @transform_1, window_bounds = array<i64: 288, 32>}, {pipeline_mode = #tpu.pipeline_mode<synchronous>, transform_indices = @transform_2, window_bounds = array<i64: 1, 32>}, {pipeline_mode = #tpu.pipeline_mode<synchronous>, transform_indices = @transform_3, window_bounds = array<i64: 32, 128>}, {pipeline_mode = #tpu.pipeline_mode<synchronous>, transform_indices = @transform_4, window_bounds = array<i64: 1, 128>}, {pipeline_mode = #tpu.pipeline_mode<synchronous>, transform_indices = @transform_5, window_bounds = array<i64: 32, 128>}, {pipeline_mode = #tpu.pipeline_mode<synchronous>, transform_indices = @transform_6, window_bounds = array<i64: 1, 128>}, {transform_indices = @transform_7, window_bounds = array<i64: 64, 128>}, {transform_indices = @transform_8, window_bounds = array<i64: 64, 128>}, {transform_indices = @transform_9, window_bounds = array<i64: 64, 128>}, {transform_indices = @transform_10, window_bounds = array<i64: 64, 128>}, {transform_indices = @transform_11, window_bounds = array<i64: 64, 128>}]} {
    %c0 = arith.constant 0 : index
    %c0_0 = arith.constant 0 : index
    %0 = vector.load %arg1[%c0, %c0_0] : memref<64x288xbf16, #tpu.memory_space<vmem>>, vector<64x288xbf16>
    %1 = vector.extract_strided_slice %0 {offsets = [0, 0], sizes = [64, 32], strides = [1, 1]} : vector<64x288xbf16> to vector<64x32xbf16>
    %c0_1 = arith.constant 0 : index
    %c0_2 = arith.constant 0 : index
    %2 = vector.load %arg2[%c0_1, %c0_2] : memref<288x32xbf16, #tpu.memory_space<vmem>>, vector<288x32xbf16>
    %cst = arith.constant dense<0.000000e+00> : vector<64x32xf32>
    %3 = tpu.matmul %0, %2, %cst {dimension_numbers = #tpu.dot_dimension_numbers<[1], [0], [0], [1], [0, 0, 1, 1], [], []>} : vector<64x288xbf16>, vector<288x32xbf16>, vector<64x32xf32> -> vector<64x32xf32>
    %c0_3 = arith.constant 0 : index
    %c0_4 = arith.constant 0 : index
    %4 = vector.load %arg3[%c0_3, %c0_4] : memref<1x32xf32, #tpu.memory_space<vmem>>, vector<1x32xf32>
    %5 = vector.broadcast %4 : vector<1x32xf32> to vector<64x32xf32>
    %6 = arith.addf %3, %5 : vector<64x32xf32>
    %c0_5 = arith.constant 0 : index
    %c0_6 = arith.constant 0 : index
    %7 = vector.load %arg4[%c0_5, %c0_6] : memref<32x128xbf16, #tpu.memory_space<vmem>>, vector<32x128xbf16>
    %cst_7 = arith.constant dense<0.000000e+00> : vector<64x128xf32>
    %8 = tpu.matmul %1, %7, %cst_7 {dimension_numbers = #tpu.dot_dimension_numbers<[1], [0], [0], [1], [0, 0, 1, 1], [], []>} : vector<64x32xbf16>, vector<32x128xbf16>, vector<64x128xf32> -> vector<64x128xf32>
    %c0_8 = arith.constant 0 : index
    %c0_9 = arith.constant 0 : index
    %9 = vector.load %arg5[%c0_8, %c0_9] : memref<1x128xf32, #tpu.memory_space<vmem>>, vector<1x128xf32>
    %10 = vector.broadcast %9 : vector<1x128xf32> to vector<64x128xf32>
    %11 = arith.addf %8, %10 : vector<64x128xf32>
    %c0_10 = arith.constant 0 : index
    %c0_11 = arith.constant 0 : index
    %12 = vector.load %arg11[%c0_10, %c0_11] : memref<64x128xf32, #tpu.memory_space<vmem>>, vector<64x128xf32>
    tpu.vector_store %arg11[%c0_10, %c0_11], %11 {strides = array<i32>} : memref<64x128xf32, #tpu.memory_space<vmem>>, vector<64x128xf32>,
    %13 = arith.truncf %6 : vector<64x32xf32> to vector<64x32xbf16>
    %c0_12 = arith.constant 0 : index
    %c0_13 = arith.constant 0 : index
    %14 = vector.load %arg6[%c0_12, %c0_13] : memref<32x128xbf16, #tpu.memory_space<vmem>>, vector<32x128xbf16>
    %cst_14 = arith.constant dense<0.000000e+00> : vector<64x128xf32>
    %15 = tpu.matmul %13, %14, %cst_14 {dimension_numbers = #tpu.dot_dimension_numbers<[1], [0], [0], [1], [0, 0, 1, 1], [], []>} : vector<64x32xbf16>, vector<32x128xbf16>, vector<64x128xf32> -> vector<64x128xf32>
    %c0_15 = arith.constant 0 : index
    %c0_16 = arith.constant 0 : index
    %16 = vector.load %arg7[%c0_15, %c0_16] : memref<1x128xf32, #tpu.memory_space<vmem>>, vector<1x128xf32>
    %17 = vector.broadcast %16 : vector<1x128xf32> to vector<64x128xf32>
    %18 = arith.addf %15, %17 : vector<64x128xf32>
    %c0_17 = arith.constant 0 : index
    %c0_18 = arith.constant 0 : index
    %19 = vector.load %arg12[%c0_17, %c0_18] : memref<64x128xf32, #tpu.memory_space<vmem>>, vector<64x128xf32>
    tpu.vector_store %arg12[%c0_17, %c0_18], %18 {strides = array<i32>} : memref<64x128xf32, #tpu.memory_space<vmem>>, vector<64x128xf32>,
    %c0_19 = arith.constant 0 : index
    %c0_20 = arith.constant 0 : index
    %20 = vector.load %arg8[%c0_19, %c0_20] : memref<64x128xf32, #tpu.memory_space<vmem>>, vector<64x128xf32>
    %c0_21 = arith.constant 0 : index
    %c0_22 = arith.constant 0 : index
    %21 = vector.load %arg9[%c0_21, %c0_22] : memref<64x128xf32, #tpu.memory_space<vmem>>, vector<64x128xf32>
    %22 = tpu.iota {dimensions = array<i32: 1>} : vector<64x128xi32>
    %c4_i32 = arith.constant 4 : i32
    %c0_i32 = arith.constant 0 : i32
    %23 = arith.cmpi eq, %c4_i32, %c0_i32 : i32
    %c1_i32 = arith.constant 1 : i32
    %24 = arith.select %23, %c1_i32, %c4_i32 : i32
    %25 = vector.broadcast %24 : i32 to vector<64x128xi32>
    %26 = arith.remsi %22, %25 : vector<64x128xi32>
    %c0_i32_23 = arith.constant 0 : i32
    %27 = vector.broadcast %c0_i32_23 : i32 to vector<64x128xi32>
    %28 = arith.cmpi ne, %26, %27 : vector<64x128xi32>
    %c0_i32_24 = arith.constant 0 : i32
    %29 = vector.broadcast %c0_i32_24 : i32 to vector<64x128xi32>
    %30 = arith.cmpi slt, %26, %29 : vector<64x128xi32>
    %c0_i32_25 = arith.constant 0 : i32
    %31 = arith.cmpi slt, %24, %c0_i32_25 : i32
    %32 = vector.broadcast %31 : i1 to vector<64x128xi1>
    %33 = vector.broadcast %32 : vector<64x128xi1> to vector<64x128xi1>
    %34 = arith.xori %30, %33 : vector<64x128xi1>
    %35 = arith.andi %34, %28 : vector<64x128xi1>
    %36 = vector.broadcast %24 : i32 to vector<64x128xi32>
    %37 = arith.addi %26, %36 : vector<64x128xi32>
    %38 = arith.select %35, %37, %26 : vector<64x128xi1>, vector<64x128xi32>
    %c2_i32 = arith.constant 2 : i32
    %39 = vector.broadcast %c2_i32 : i32 to vector<64x128xi32>
    %40 = arith.cmpi sge, %38, %39 : vector<64x128xi32>
    %41 = math.exp %11 : vector<64x128xf32>
    %42 = arith.mulf %20, %41 : vector<64x128xf32>
    %43 = arith.mulf %11, %21 : vector<64x128xf32>
    %44 = arith.addf %20, %43 : vector<64x128xf32>
    %45 = arith.select %40, %42, %44 : vector<64x128xi1>, vector<64x128xf32>
    %c0_26 = arith.constant 0 : index
    %c0_27 = arith.constant 0 : index
    %46 = vector.load %arg10[%c0_26, %c0_27] : memref<64x128xf32, #tpu.memory_space<vmem>>, vector<64x128xf32>
    tpu.vector_store %arg10[%c0_26, %c0_27], %45 {strides = array<i32>} : memref<64x128xf32, #tpu.memory_space<vmem>>, vector<64x128xf32>,
    return
  }
  func.func @transform_0(%arg0: i32) -> (i32, i32) {
    %c0_i32 = arith.constant 0 : i32
    %c0_i32_0 = arith.constant 0 : i32
    return %arg0, %c0_i32 : i32, i32
  }
  func.func @transform_1(%arg0: i32) -> (i32, i32) {
    %c0_i32 = arith.constant 0 : i32
    %c0_i32_0 = arith.constant 0 : i32
    %c0_i32_1 = arith.constant 0 : i32
    return %c0_i32, %c0_i32_0 : i32, i32
  }
  func.func @transform_2(%arg0: i32) -> (i32, i32) {
    %c0_i32 = arith.constant 0 : i32
    %c0_i32_0 = arith.constant 0 : i32
    %c0_i32_1 = arith.constant 0 : i32
    return %c0_i32, %c0_i32_0 : i32, i32
  }
  func.func @transform_3(%arg0: i32) -> (i32, i32) {
    %c0_i32 = arith.constant 0 : i32
    %c0_i32_0 = arith.constant 0 : i32
    %c0_i32_1 = arith.constant 0 : i32
    return %c0_i32, %c0_i32_0 : i32, i32
  }
  func.func @transform_4(%arg0: i32) -> (i32, i32) {
    %c0_i32 = arith.constant 0 : i32
    %c0_i32_0 = arith.constant 0 : i32
    %c0_i32_1 = arith.constant 0 : i32
    return %c0_i32, %c0_i32_0 : i32, i32
  }
  func.func @transform_5(%arg0: i32) -> (i32, i32) {
    %c0_i32 = arith.constant 0 : i32
    %c0_i32_0 = arith.constant 0 : i32
    %c0_i32_1 = arith.constant 0 : i32
    return %c0_i32, %c0_i32_0 : i32, i32
  }
  func.func @transform_6(%arg0: i32) -> (i32, i32) {
    %c0_i32 = arith.constant 0 : i32
    %c0_i32_0 = arith.constant 0 : i32
    %c0_i32_1 = arith.constant 0 : i32
    return %c0_i32, %c0_i32_0 : i32, i32
  }
  func.func @transform_7(%arg0: i32) -> (i32, i32) {
    %c0_i32 = arith.constant 0 : i32
    %c0_i32_0 = arith.constant 0 : i32
    return %arg0, %c0_i32 : i32, i32
  }
  func.func @transform_8(%arg0: i32) -> (i32, i32) {
    %c0_i32 = arith.constant 0 : i32
    %c0_i32_0 = arith.constant 0 : i32
    return %arg0, %c0_i32 : i32, i32
  }
  func.func @transform_9(%arg0: i32) -> (i32, i32) {
    %c0_i32 = arith.constant 0 : i32
    %c0_i32_0 = arith.constant 0 : i32
    return %arg0, %c0_i32 : i32, i32
  }
  func.func @transform_10(%arg0: i32) -> (i32, i32) {
    %c0_i32 = arith.constant 0 : i32
    %c0_i32_0 = arith.constant 0 : i32
    return %arg0, %c0_i32 : i32, i32
  }
  func.func @transform_11(%arg0: i32) -> (i32, i32) {
    %c0_i32 = arith.constant 0 : i32
    %c0_i32_0 = arith.constant 0 : i32
    return %arg0, %c0_i32 : i32, i32
  }
}

</mosaic_0001>

<bundles_post_ra>
// kernel: tpu_custom_call.1
= control target key start
LH: loop header
LB: loop body
LE: loop exit
PB: predicated region body
PF: predicated region fallthrough
CT: control target
= control target key end

     0   :  { %17 = vsyncpa [#allocation3], 0  ;;  %s1365_s0 = inlined_call_operand.vmem [shape: bf16[64,288], index: 0, kind: input, shape index: {}]   ;;  %s1366_s1 = inlined_call_operand.vmem [shape: bf16[288,32], index: 1, kind: input, shape index: {}]   ;;  %s1367_s2 = inlined_call_operand.vmem [shape: f32[1,32], index: 2, kind: input, shape index: {}]   ;;  %s1368_s3 = inlined_call_operand.vmem [shape: bf16[32,128], index: 3, kind: input, shape index: {}]   ;;  %s1369_s4 = inlined_call_operand.vmem [shape: f32[1,128], index: 4, kind: input, shape index: {}]   ;;  %s1370_s5 = inlined_call_operand.vmem [shape: bf16[32,128], index: 5, kind: input, shape index: {}]   ;;  %s1371_s6 = inlined_call_operand.vmem [shape: f32[1,128], index: 6, kind: input, shape index: {}]   ;;  %s1372_s7 = inlined_call_operand.vmem [shape: f32[64,128], index: 7, kind: input, shape index: {}]   ;;  %s1373_s8 = inlined_call_operand.hbm [shape: f32[64,128], index: 8, kind: input, shape index: {}]   ;;  %s1374_s9 = inlined_call_operand.hbm [shape: f32[64,128], index: 9, kind: output, shape index: {0}]   ;;  %s1375_s10 = inlined_call_operand.hbm [shape: f32[64,128], index: 10, kind: output, shape index: {1}]   ;;  %s1376_s11 = inlined_call_operand.hbm [shape: f32[64,128], index: 11, kind: output, shape index: {2}]  }
   0x1   :  { %18 = vsyncpa [#allocation4], 0 }
   0x2   :  { %19 = vsyncpa [#allocation7], 0  ;;  %s1066_s17 = smov [#allocation2]  }
   0x3   :  { %s41_s18 = sshll.u32 %s1066_s17, 4  ;;  %s42_s18 = int_to_ptr.vmem [resolvable:$true] %s41_s18 }
   0x4   :  { %s988_s19 = scalar_lea.vmem %s42_s18, 1024  ;;  %p993_p1 = scmp.lt.s32.totalorder %s42_s18, %s42_s18 }
   0x5   :  { %p989_p0 = scmp.ne.s32.totalorder %s42_s18, %s988_s19  ;;  %p994_p2 = scmp.lt.s32.totalorder %s988_s19, %s988_s19 }
   0x7   :  { %p995_p3 = por %p994_p2, %p993_p1 }
   0x9   :  { %p996_p4 = pnand %p995_p3, %p989_p0 }
   0xb   :  { %999 = shalt.err (!%p996_p4)
}
   0xc   :  { %s1067_s20 = smov 128   ;;  %s1068_s21 = smov 8  }
   0xd   :  { %47 = dma.hbm_to_vmem [thread:$0]  %s1373_s8, 1024, %s42_s18, [#allocation3], %s1067_s20, %s1067_s20, %s1068_s21  }
   0xe   :  { %1060 = dma.done.wait [#allocation3], 1024  }
   0xf   :  { %1061 = vsyncadd [#allocation3], 4294966272  ;;  %v926_v0 = vld [vmem:[%s1366_s1 + $0x78] sm:$0xff]   ;;  %v928_v2 = vld [vmem:[%s1366_s1 + $0x70] sm:$0xff]   ;;  %vm279_vm0 = vcmask 261120   ;;  %s1070_s13 = smov [#allocation5]  }
  0x10   :  { %v927_v1 = vld [vmem:[%s1366_s1 + $0x38] sm:$0xff]   ;;  %826 = vmatprep.subr.bf16.mxu0 %v926_v0  ;;  %v929_v3 = vld [vmem:[%s1366_s1 + $0x30] sm:$0xff]   ;;  %v930_v4 = vld [vmem:[%s1366_s1 + $0x68] sm:$0xff]   ;;  %s734_s14 = sshll.u32 %s1070_s13, 4  ;;  %s735_s14 = int_to_ptr.vmem [resolvable:$true] %s734_s14 }
  0x11   :  { %827 = vmatpush3.bf16.msra.mxu0 %v927_v1  ;;  %v931_v5 = vld [vmem:[%s1366_s1 + $0x28] sm:$0xff]   ;;  %v932_v6 = vld [vmem:[%s1366_s1 + $0x60] sm:$0xff]   ;;  %v934_v8 = vld [vmem:[%s1366_s1 + $0x58] sm:$0xff]  }
  0x12   :  { %828 = vmatprep.subr.bf16.mxu0 %v928_v2  ;;  %v933_v7 = vld [vmem:[%s1366_s1 + $0x20] sm:$0xff]   ;;  %v935_v9 = vld [vmem:[%s1366_s1 + $0x18] sm:$0xff]   ;;  %v941_v10 = vld [vmem:[%s1366_s1 + $0x88] sm:$0xff]   ;;  %v658_v2 = vlaneseq }
  0x13   :  { %v936_v11 = vld [vmem:[%s1366_s1 + $0x50] sm:$0xff]   ;;  %884 = vmatprep.subr.bf16.mxu1 %v941_v10  ;;  %v938_v13 = vld [vmem:[%s1366_s1 + $0x48] sm:$0xff]   ;;  %v946_v15 = vld [vmem:[%s1366_s1 + $0x80] sm:$0xff]  }
  0x14   :  { %v937_v12 = vld [vmem:[%s1366_s1 + $0x10] sm:$0xff]   ;;  %885 = vmatpush3.bf16.msra.mxu1 %v941_v10  ;;  %v948_v17 = vld [vmem:[%s1365_s0 + $0x20] ss:$12 sps:$4 sm:$0xff]   ;;  %v955_v20 = vld [vmem:[%s1365_s0 + $0x38] ss:$12 sps:$4 sm:$0xff]  }
  0x15   :  { %829 = vmatpush3.bf16.msra.mxu0 %v929_v3  ;;  %v945_v14 = vld [vmem:[%s1365_s0 + $0x4] ss:$12 sps:$4 sm:$0xff]   ;;  %v947_v16 = vld [vmem:[%s1365_s0 + $0x8] ss:$12 sps:$4 sm:$0xff]   ;;  %886 = vmatprep.subr.bf16.mxu1 %v946_v15  ;;  %v943_v25 = vld [vmem:[%s1365_s0] ss:$12 sps:$4 sm:$0xff]  }
  0x16   :  { %830 = vmatprep.subr.bf16.mxu0 %v930_v4  ;;  %324 = vmatprep.mubr.bf16.mxu0 %v945_v14  ;;  %v939_v18 = vld [vmem:[%s1366_s1 + $0x8] sm:$0xff]   ;;  %v940_v19 = vld [vmem:[%s1366_s1 + $0x40] sm:$0xff]   ;;  %v956_v22 = vld [vmem:[%s1365_s0 + $0x50] ss:$12 sps:$4 sm:$0xff]  }
  0x17   :  { %888 = vmatprep.mubr.msk.bf16.mxu1 %vm279_vm0, %v947_v16  ;;  %v942_v21 = vld [vmem:[%s1366_s1] sm:$0xff]   ;;  %v960_v23 = vld [vmem:[%s1368_s3 + $0x8] sm:$0xff]   ;;  %v954_v29 = vld [vmem:[%s1365_s0 + $0x30] ss:$12 sps:$4 sm:$0xff]   ;;  %v659_v16 = vand.u32 127, %v658_v2 }
  0x18   :  { %887 = vmatpush3.bf16.msra.mxu1 %v946_v15  ;;  %v961_v24 = vld [vmem:[%s1368_s3] sm:$0xff]   ;;  %v949_v26 = vld [vmem:[%s1365_s0 + $0x1c] ss:$12 sps:$4 sm:$0xff]   ;;  %v957_v30 = vld [vmem:[%s1365_s0 + $0x4c] ss:$12 sps:$4 sm:$0xff]  }
  0x19   :  { %831 = vmatpush3.bf16.msra.mxu0 %v931_v5  ;;  %896 = vmatprep.subr.bf16.mxu1 %v960_v23  ;;  %v951_v27 = vld [vmem:[%s1365_s0 + $0x18] ss:$12 sps:$4 sm:$0xff]   ;;  %v952_v28 = vld [vmem:[%s1365_s0 + $0x34] ss:$12 sps:$4 sm:$0xff]   ;;  %v962_v32 = vld [vmem:[%s1370_s5 + $0x8] sm:$0xff]  }
  0x1a   :  { %832 = vmatprep.subr.bf16.mxu0 %v932_v6  ;;  %v959_v31 = vld [vmem:[%s1365_s0 + $0x48] ss:$12 sps:$4 sm:$0xff]   ;;  %v963_v33 = vld [vmem:[%s1370_s5] sm:$0xff]  }
  0x1b   :  { %889 = vmatmul.mubr.msk.bf16.vlgmr.msra.gmra.mxu1 %vm279_vm0, %v948_v17  ;;  %v1257_v45 = vld [vmem:[%s1367_s2] ss:$0 sm:$0xff]  ;;  %v652_v15 = vld [vmem:[#allocation2 + $0x10] sm:$0xff] }
  0x1c   :  { %892 = vmatprep.mubr.msk.bf16.mxu1 %vm279_vm0, %v955_v20  ;;  %897 = vmatpush3.bf16.msra.mxu1 %v960_v23  ;;  %v1264_v47 = vld [vmem:[%s1369_s4] ss:$0 sm:$0xff] }
  0x1d   :  { %833 = vmatpush3.bf16.msra.mxu0 %v933_v7  ;;  %898 = vmatprep.subr.bf16.mxu1 %v961_v24  ;;  %v650_v23 = vld [vmem:[#allocation2] sm:$0xff] }
  0x1e   :  { %834 = vmatprep.subr.bf16.mxu0 %v934_v8 }
  0x20   :  { %899 = vmatpush3.bf16.msra.mxu1 %v961_v24 }
  0x21   :  { %835 = vmatpush3.bf16.msra.mxu0 %v935_v9  ;;  %908 = vmatprep.subr.bf16.mxu1 %v962_v32 }
  0x22   :  { %836 = vmatprep.subr.bf16.mxu0 %v936_v11 }
  0x23   :  { %893 = vmatmul.mubr.msk.bf16.gmra.mxu1 %vm279_vm0, %v956_v22 }
  0x24   :  { %900 = vmatprep.mubr.msk.bf16.mxu1 %vm279_vm0, %v943_v25 }
  0x25   :  { %837 = vmatpush3.bf16.msra.mxu0 %v937_v12 }
  0x26   :  { %838 = vmatprep.subr.bf16.mxu0 %v938_v13 }
  0x29   :  { %839 = vmatpush3.bf16.msra.mxu0 %v939_v18 }
  0x2a   :  { %840 = vmatprep.subr.bf16.mxu0 %v940_v19 }
  0x2b   :  { %901 = vmatmul.mubr.msk.bf16.vlgmr.msra.gmra.mxu1 %vm279_vm0, %v951_v27 }
  0x2c   :  { %904 = vmatprep.mubr.msk.bf16.mxu1 %vm279_vm0, %v954_v29  ;;  %909 = vmatpush3.bf16.msra.mxu1 %v962_v32 }
  0x2d   :  { %841 = vmatpush3.bf16.msra.mxu0 %v942_v21  ;;  %910 = vmatprep.subr.bf16.mxu1 %v963_v33 }
  0x30   :  { %325 = vmatmul.mubr.bf16.vlgmr.msra.gmra.mxu0 %v943_v25  ;;  %911 = vmatpush3.bf16.msra.mxu1 %v963_v33 }
  0x31   :  { %332 = vmatprep.mubr.bf16.mxu0 %v949_v26 }
  0x33   :  { %905 = vmatmul.mubr.msk.bf16.gmra.mxu1 %vm279_vm0, %v959_v31 }
  0x38   :  { %333 = vmatmul.mubr.bf16.gmra.mxu0 %v951_v27 }
  0x39   :  { %340 = vmatprep.mubr.bf16.mxu0 %v952_v28 }
  0x40   :  { %341 = vmatmul.mubr.bf16.gmra.mxu0 %v954_v29 }
  0x41   :  { %348 = vmatprep.mubr.bf16.mxu0 %v957_v30  ;;  %v644_v30 = vld [vmem:[%s1372_s7 + $0x10] sm:$0xff] }
  0x48   :  { %349 = vmatmul.mubr.bf16.gmra.mxu0 %v959_v31  ;;  %v664_v31 = vand.u32 3, %v659_v16 }
  0x4a   :  { %vm1296_vm1 = vcmp.ge.s32.totalorder %v664_v31, 2 }
  0xdb   :  { %v890_v34 = vpop.f32.mrf.mxu1 }
  0xdd   :  { %v391_v35 = vpop.f32.mrf.mxu1 }
  0xdf   :  { %v891_v36 = vpop.f32.mrf.mxu1 }
  0xe1   :  { %v394_v37 = vpop.f32.mrf.mxu1 }
  0xe3   :  { %v1248_v38 = vpop.f32.mrf.mxu1 }
  0xe5   :  { %v1250_v40 = vpop.f32.mrf.mxu1 }
  0xe7   :  { %v1252_v43 = vpop.f32.mrf.mxu1 }
  0xe9   :  { %v1259_v46 = vpop.f32.mrf.mxu1 }
  0xeb   :  { %v902_v51 = vpop.f32.mrf.mxu1 }
  0xec   :  { %v500_v53 = vadd.f32 %v902_v51, %v1264_v47 }
  0xed   :  { %v491_v55 = vpop.f32.mrf.mxu1 }
  0xee   :  { %524 = vst [vmem:[#allocation6 + $0x10] sm:$0xff] %v500_v53  ;;  %v677_v57 = vmul.f32 1.442695, %v500_v53  ;;  %v492_v58 = vadd.f32 %v1264_v47, %v491_v55  ;;  %v699_v27 = vmul.f32 %v652_v15, %v500_v53  ;;  %v656_v55 = vld [vmem:[#allocation2 + $0x30] sm:$0xff] }
  0xef   :  { %v903_v62 = vpop.f32.mrf.mxu1 }
  0xf0   :  { %v842_v39 = vpop.f32.mrf.mxu0  ;;  %964 = vpow2.f32 %v677_v57  ;;  %522 = vst [vmem:[#allocation6] sm:$0xff] %v492_v58  ;;  %v673_v0 = vmul.f32 1.442695, %v492_v58  ;;  %v503_v3 = vadd.f32 %v903_v62, %v1264_v47 }
  0xf1   :  { %v494_v4 = vpop.f32.mrf.mxu1 }
  0xf2   :  { %v843_v41 = vpop.f32.mrf.mxu0  ;;  %966 = vpow2.f32 %v673_v0  ;;  %v495_v6 = vadd.f32 %v1264_v47, %v494_v4  ;;  %525 = vst [vmem:[#allocation6 + $0x18] sm:$0xff] %v503_v3  ;;  %v679_v9 = vmul.f32 1.442695, %v503_v3 }
  0xf3   :  { %v844_v42 = vadd.f32 %v843_v41, %v842_v39  ;;  %v906_v10 = vpop.f32.mrf.mxu1 }
  0xf4   :  { %v845_v44 = vpop.f32.mrf.mxu0  ;;  %523 = vst [vmem:[#allocation6 + $0x8] sm:$0xff] %v495_v6  ;;  %v675_v12 = vmul.f32 1.442695, %v495_v6  ;;  %v516_v13 = vadd.f32 %v906_v10, %v1264_v47  ;;  %968 = vpow2.f32 %v679_v9  ;;  %v657_v9 = vld [vmem:[#allocation2 + $0x38] sm:$0xff] }
  0xf5   :  { %v327_v50 = vadd.f32 %v844_v42, %v1257_v45  ;;  %v507_v17 = vpop.f32.mrf.mxu1 }
  0xf6   :  { %v846_v48 = vpop.f32.mrf.mxu0  ;;  %970 = vpow2.f32 %v675_v12  ;;  %528 = vst [vmem:[#allocation6 + $0x30] sm:$0xff] %v516_v13  ;;  %v685_v19 = vmul.f32 1.442695, %v516_v13  ;;  %v1277_v24 = vadd.f32 %v1264_v47, %v507_v17 }
  0xf7   :  { %v847_v49 = vadd.f32 %v846_v48, %v845_v44  ;;  %v392_v59 = vadd.f32 %v391_v35, %v327_v50  ;;  %v907_v25 = vpop.f32.mrf.mxu1  ;;  %v697_v35 = vmul.f32 %v650_v23, %v492_v58  ;;  %v642_v44 = vld [vmem:[%s1372_s7] sm:$0xff]  ;;  %v651_v48 = vld [vmem:[#allocation2 + $0x8] sm:$0xff]  ;;  %v707_v50 = vadd.f32 %v699_v27, %v644_v30  ;;  %v649_v27 = vld [vmem:[%s1372_s7 + $0x38] sm:$0xff] }
  0xf8   :  { %v848_v52 = vpop.f32.mrf.mxu0  ;;  %972 = vpow2.f32 %v685_v19  ;;  %v1280_v28 = vadd.f32 %v907_v25, %v1264_v47  ;;  %526 = vst [vmem:[#allocation6 + $0x20] sm:$0xff] %v1277_v24  ;;  %v681_v32 = vmul.f32 1.442695, %v1277_v24 }
  0xf9   :  { %v330_v54 = vadd.f32 %v847_v49, %v1257_v45  ;;  %v510_v33 = vpop.f32.mrf.mxu1  ;;  %v705_v58 = vadd.f32 %v697_v35, %v642_v44 }
  0xfa   :  { %v849_v56 = vpop.f32.mrf.mxu0  ;;  %529 = vst [vmem:[#allocation6 + $0x38] sm:$0xff] %v1280_v28  ;;  %v511_v39 = vadd.f32 %v1264_v47, %v510_v33  ;;  %974 = vpow2.f32 %v681_v32 }
  0xfb   :  { %v850_v60 = vadd.f32 %v849_v56, %v848_v52  ;;  %v395_v61 = vadd.f32 %v394_v37, %v330_v54  ;;  %v687_v37 = vmul.f32 1.442695, %v1280_v28 }
  0xfc   :  { %v851_v63 = vpop.f32.mrf.mxu0  ;;  %527 = vst [vmem:[#allocation6 + $0x28] sm:$0xff] %v511_v39  ;;  %v683_v51 = vmul.f32 1.442695, %v511_v39 }
  0xfd   :  { %v530_v1 = vpack.c.bf16 %v395_v61, %v392_v59  ;;  %v335_v7 = vadd.f32 %v850_v60, %v1257_v45  ;;  %976 = vpow2.f32 %v687_v37  ;;  %v965_v52 = vpop.eup %964  ;;  %v645_v59 = vld [vmem:[%s1372_s7 + $0x18] sm:$0xff]  ;;  %v698_v60 = vmul.f32 %v651_v48, %v495_v6 }
  0xfe   :  { %v852_v5 = vpop.f32.mrf.mxu0  ;;  %v691_v57 = vmul.f32 %v965_v52, %v644_v30  ;;  %978 = vpow2.f32 %v683_v51 }
  0xff   :  { %v853_v8 = vadd.f32 %v852_v5, %v851_v63  ;;  %912 = vmatprep.mubr.msk.bf16.mxu1 %vm279_vm0, %v530_v1  ;;  %v400_v20 = vadd.f32 %v890_v34, %v335_v7  ;;  %v967_v61 = vpop.eup %966  ;;  %v643_v1 = vld [vmem:[%s1372_s7 + $0x8] sm:$0xff]  ;;  %v703_v5 = vmul.f32 %v656_v55, %v516_v13  ;;  %v654_v7 = vld [vmem:[#allocation2 + $0x20] sm:$0xff] }
 0x100   :  { %v854_v11 = vpop.f32.mrf.mxu0  ;;  %v689_v4 = vmul.f32 %v967_v61, %v642_v44  ;;  %v706_v12 = vadd.f32 %v698_v60, %v643_v1  ;;  %v701_v17 = vmul.f32 %v654_v7, %v1277_v24 }
 0x101   :  { %v338_v14 = vadd.f32 %v853_v8, %v1257_v45 }
 0x102   :  { %v855_v18 = vpop.f32.mrf.mxu0 }
 0x103   :  { %v403_v21 = vadd.f32 %v891_v36, %v338_v14  ;;  %v856_v22 = vadd.f32 %v855_v18, %v854_v11  ;;  %v653_v36 = vld [vmem:[#allocation2 + $0x18] sm:$0xff]  ;;  %v713_v11 = vsel %vm1296_vm1, %v689_v4, %v705_v58  ;;  %v655_v18 = vld [vmem:[#allocation2 + $0x28] sm:$0xff] }
 0x104   :  { %v857_v26 = vpop.f32.mrf.mxu0  ;;  %v700_v54 = vmul.f32 %v653_v36, %v503_v3  ;;  %v715_v3 = vsel %vm1296_vm1, %v691_v57, %v707_v50  ;;  %721 = vst [vmem:[#allocation5] sm:$0xff] %v713_v11  ;;  %v702_v30 = vmul.f32 %v655_v18, %v511_v39 }
 0x105   :  { %v531_v29 = vpack.c.bf16 %v403_v21, %v400_v20  ;;  %v343_v42 = vadd.f32 %v856_v22, %v1257_v45  ;;  %723 = vst [vmem:[#allocation5 + $0x10] sm:$0xff] %v715_v3  ;;  %v646_v21 = vld [vmem:[%s1372_s7 + $0x20] sm:$0xff]  ;;  %v704_v22 = vmul.f32 %v657_v9, %v1280_v28 }
 0x106   :  { %v858_v34 = vpop.f32.mrf.mxu0  ;;  %v708_v6 = vadd.f32 %v700_v54, %v645_v59  ;;  %v709_v32 = vadd.f32 %v701_v17, %v646_v21 }
 0x107   :  { %v859_v41 = vadd.f32 %v858_v34, %v857_v26  ;;  %913 = vmatmul.mubr.msk.bf16.vlgmr.msra.gmra.mxu1 %vm279_vm0, %v531_v29  ;;  %v408_v62 = vadd.f32 %v1250_v40, %v343_v42  ;;  %v648_v40 = vld [vmem:[%s1372_s7 + $0x30] sm:$0xff]  ;;  %v712_v35 = vadd.f32 %v704_v22, %v649_v27 }
 0x108   :  { %v860_v49 = vpop.f32.mrf.mxu0  ;;  %v711_v20 = vadd.f32 %v703_v5, %v648_v40 }
 0x109   :  { %v346_v53 = vadd.f32 %v859_v41, %v1257_v45 }
 0x10a   :  { %v861_v56 = vpop.f32.mrf.mxu0 }
 0x10b   :  { %v862_v63 = vadd.f32 %v861_v56, %v860_v49  ;;  %v411_v0 = vadd.f32 %v1259_v46, %v346_v53  ;;  %v969_v46 = vpop.eup %968 }
 0x10c   :  { %v863_v2 = vpop.f32.mrf.mxu0  ;;  %v971_v14 = vpop.eup %970  ;;  %v692_v13 = vmul.f32 %v969_v46, %v645_v59 }
 0x10d   :  { %v532_v8 = vpack.c.bf16 %v411_v0, %v408_v62  ;;  %v351_v15 = vadd.f32 %v862_v63, %v1257_v45  ;;  %v690_v19 = vmul.f32 %v971_v14, %v643_v1  ;;  %v973_v23 = vpop.eup %972 }
 0x10e   :  { %v864_v10 = vpop.f32.mrf.mxu0  ;;  %v716_v26 = vsel %vm1296_vm1, %v692_v13, %v708_v6  ;;  %v695_v29 = vmul.f32 %v973_v23, %v648_v40  ;;  %v975_v33 = vpop.eup %974 }
 0x10f   :  { %v865_v16 = vadd.f32 %v864_v10, %v863_v2  ;;  %916 = vmatprep.mubr.msk.bf16.mxu1 %vm279_vm0, %v532_v8  ;;  %724 = vst [vmem:[#allocation5 + $0x18] sm:$0xff] %v716_v26  ;;  %v714_v24 = vsel %vm1296_vm1, %v690_v19, %v706_v12  ;;  %v416_v31 = vadd.f32 %v1248_v38, %v351_v15  ;;  %v977_v36 = vpop.eup %976 }
 0x110   :  { %722 = vst [vmem:[#allocation5 + $0x8] sm:$0xff] %v714_v24  ;;  %v719_v34 = vsel %vm1296_vm1, %v695_v29, %v711_v20  ;;  %v693_v41 = vmul.f32 %v975_v33, %v646_v21  ;;  %v696_v39 = vmul.f32 %v977_v36, %v649_v27  ;;  %v979_v38 = vpop.eup %978 }
 0x111   :  { %v354_v25 = vadd.f32 %v865_v16, %v1257_v45  ;;  %v647_v45 = vld [vmem:[%s1372_s7 + $0x28] sm:$0xff]  ;;  %727 = vst [vmem:[#allocation5 + $0x30] sm:$0xff] %v719_v34  ;;  %s1069_s7 = smov [#allocation6]  }
 0x112   :  { %v710_v42 = vadd.f32 %v702_v30, %v647_v45  ;;  %v720_v44 = vsel %vm1296_vm1, %v696_v39, %v712_v35  ;;  %v694_v48 = vmul.f32 %v979_v38, %v647_v45  ;;  %s746_s8 = sshll.u32 %s1069_s7, 4  ;;  %s747_s8 = int_to_ptr.vmem [resolvable:$true] %s746_s8 }
 0x113   :  { %v419_v28 = vadd.f32 %v1252_v43, %v354_v25  ;;  %v717_v43 = vsel %vm1296_vm1, %v693_v41, %v709_v32  ;;  %728 = vst [vmem:[#allocation5 + $0x38] sm:$0xff] %v720_v44  ;;  %s1000_s15 = scalar_lea.vmem %s747_s8, 1024  ;;  %p1005_p6 = scmp.lt.s32.totalorder %s747_s8, %s747_s8 }
 0x114   :  { %725 = vst [vmem:[#allocation5 + $0x20] sm:$0xff] %v717_v43  ;;  %v718_v49 = vsel %vm1296_vm1, %v694_v48, %v710_v42  ;;  %p1001_p5 = scmp.ne.s32.totalorder %s747_s8, %s1000_s15  ;;  %p1006_p7 = scmp.lt.s32.totalorder %s1000_s15, %s1000_s15 }
 0x115   :  { %v533_v37 = vpack.c.bf16 %v419_v28, %v416_v31  ;;  %726 = vst [vmem:[#allocation5 + $0x28] sm:$0xff] %v718_v49 }
 0x116   :  { %p1007_p8 = por %p1006_p7, %p1005_p6 }
 0x117   :  { %917 = vmatmul.mubr.msk.bf16.gmra.mxu1 %vm279_vm0, %v533_v37 }
 0x118   :  { %p1008_p9 = pnand %p1007_p8, %p1001_p5 }
 0x11a   :  { %1011 = shalt.err (!%p1008_p9)
}
 0x11b   :  { %752 = dma.vmem_to_hbm [thread:$0]  %s747_s8, 1024, %s1375_s10, [#allocation7], %s1067_s20, %s1067_s20, %s1068_s21  }
 0x11c   :  { %s1020_s5 = scalar_lea.vmem %s735_s14, 1024  ;;  %p1025_p11 = scmp.lt.s32.totalorder %s735_s14, %s735_s14 }
 0x11d   :  { %p1021_p10 = scmp.ne.s32.totalorder %s735_s14, %s1020_s5  ;;  %p1026_p12 = scmp.lt.s32.totalorder %s1020_s5, %s1020_s5 }
 0x11f   :  { %p1027_p13 = por %p1026_p12, %p1025_p11 }
 0x121   :  { %p1028_p0 = pnand %p1027_p13, %p1021_p10 }
 0x123   :  { %1031 = shalt.err (!%p1028_p0)
}
 0x124   :  { %740 = dma.vmem_to_hbm [thread:$0]  %s735_s14, 1024, %s1374_s9, [#allocation4], %s1067_s20, %s1067_s20, %s1068_s21  }
 0x125   :  { %v819_v50 = vld [vmem:[%s1371_s6] ss:$0 sm:$0xff]  ;;  %s1071_s9 = smov [#allocation8]  }
 0x126   :  { %s758_s6 = sshll.u32 %s1071_s9, 4  ;;  %s759_s6 = int_to_ptr.vmem [resolvable:$true] %s758_s6 }
 0x127   :  { %s1040_s10 = scalar_lea.vmem %s759_s6, 1024  ;;  %p1045_p2 = scmp.lt.s32.totalorder %s759_s6, %s759_s6 }
 0x128   :  { %p1041_p1 = scmp.ne.s32.totalorder %s759_s6, %s1040_s10  ;;  %p1046_p3 = scmp.lt.s32.totalorder %s1040_s10, %s1040_s10 }
 0x12a   :  { %p1047_p4 = por %p1046_p3, %p1045_p2 }
 0x12c   :  { %p1048_p5 = pnand %p1047_p4, %p1041_p1 }
 0x1c7   :  { %v914_v51 = vpop.f32.mrf.mxu1 }
 0x1c8   :  { %v612_v52 = vadd.f32 %v914_v51, %v819_v50 }
 0x1c9   :  { %v603_v53 = vpop.f32.mrf.mxu1 }
 0x1ca   :  { %636 = vst [vmem:[#allocation8 + $0x10] sm:$0xff] %v612_v52  ;;  %v604_v47 = vadd.f32 %v819_v50, %v603_v53 }
 0x1cb   :  { %v915_v54 = vpop.f32.mrf.mxu1 }
 0x1cc   :  { %634 = vst [vmem:[#allocation8] sm:$0xff] %v604_v47  ;;  %v615_v55 = vadd.f32 %v915_v54, %v819_v50 }
 0x1cd   :  { %v606_v56 = vpop.f32.mrf.mxu1 }
 0x1ce   :  { %637 = vst [vmem:[#allocation8 + $0x18] sm:$0xff] %v615_v55  ;;  %v607_v57 = vadd.f32 %v819_v50, %v606_v56 }
 0x1d0   :  { %635 = vst [vmem:[#allocation8 + $0x8] sm:$0xff] %v607_v57 }
 0x1d7   :  { %v918_v58 = vpop.f32.mrf.mxu1 }
 0x1d8   :  { %v628_v59 = vadd.f32 %v918_v58, %v819_v50 }
 0x1d9   :  { %v619_v60 = vpop.f32.mrf.mxu1 }
 0x1da   :  { %640 = vst [vmem:[#allocation8 + $0x30] sm:$0xff] %v628_v59  ;;  %v620_v61 = vadd.f32 %v819_v50, %v619_v60 }
 0x1db   :  { %v919_v62 = vpop.f32.mrf.mxu1 }
 0x1dc   :  { %638 = vst [vmem:[#allocation8 + $0x20] sm:$0xff] %v620_v61  ;;  %v631_v63 = vadd.f32 %v919_v62, %v819_v50 }
 0x1dd   :  { %v622_v0 = vpop.f32.mrf.mxu1 }
 0x1de   :  { %641 = vst [vmem:[#allocation8 + $0x38] sm:$0xff] %v631_v63  ;;  %v623_v1 = vadd.f32 %v819_v50, %v622_v0 }
 0x1e0   :  { %639 = vst [vmem:[#allocation8 + $0x28] sm:$0xff] %v623_v1 }
 0x1e1   :  { %1051 = shalt.err (!%p1048_p5)
}
 0x1e2   :  { %764 = dma.vmem_to_hbm [thread:$0]  %s759_s6, 1024, %s1376_s11, [#allocation7], %s1067_s20, %s1067_s20, %s1068_s21  }
 0x1e3   :  { %1062 = dma.done.wait [#allocation4], 1024  }
 0x1e4   :  { %1063 = vsyncadd [#allocation4], 4294966272 }
 0x1e5   :  { %1064 = dma.done.wait [#allocation7], 2048  }
 0x1e6   :  { %1065 = vsyncadd [#allocation7], 4294965248 }
 0x1e7   :  { %774 = vsyncpa [#allocation3], 1 }
 0x1e8   :  { %775 = vsyncpa [#allocation4], 1 }
 0x1e9   :  { %776 = vsyncpa [#allocation7], 1 }

</bundles_post_ra>
